<compile_context>
chip_gen: v6e
topology: v6e:2x2x1
jax: 0.10.0
libtpu: 0.0.40
codegen_flags: <defaults>
</compile_context>

<pallas_src>
import jax
import jax.numpy as jnp
import numpy as np
from jax.experimental import pallas as pl
from jax.experimental.pallas import tpu as pltpu


# --------------------------------------------------------------------------
# Bilinear interpolation operators (PyTorch align_corners=False semantics)
# --------------------------------------------------------------------------
def _bilinear_matrix_1d(in_size, out_size):
    """(out_size, in_size) row operator for 1-D bilinear resize."""
    o = np.arange(out_size, dtype=np.float64)
    src = (o + 0.5) * (in_size / out_size) - 0.5
    src = np.maximum(src, 0.0)                       # PyTorch clamps before floor
    i0 = np.minimum(np.floor(src).astype(np.int64), in_size - 1)
    i1 = np.minimum(i0 + 1, in_size - 1)
    w1 = src - i0
    w0 = 1.0 - w1
    u = np.zeros((out_size, in_size), dtype=np.float32)
    u[np.arange(out_size), i0] += w0
    u[np.arange(out_size), i1] += w1
    return u


def _bilinear_matrix_2d(in_hw, out_hw):
    """Flattened (out_h*out_w, in_h*in_w) separable bilinear operator."""
    uh = _bilinear_matrix_1d(in_hw[0], out_hw[0])
    uw = _bilinear_matrix_1d(in_hw[1], out_hw[1])
    return jnp.asarray(np.kron(uh, uw))              # float32


# --------------------------------------------------------------------------
# Pallas kernels
# --------------------------------------------------------------------------
def _fused_block_body(skip_ref, cur_ref, u2_ref, w_ref, scale_ref, bias_ref,
                      pad_scr):
    """upsample(2x) -> concat -> pad -> 3x3 conv -> BN -> ReLU.

    skip_ref: (1, H, W, Cs) f32      fine skip feature map
    cur_ref:  (1, h*w, Cc)  f32      coarse map, spatially flattened
    u2_ref:   (H*W, h*w)    f32      flattened 2x bilinear operator
    w_ref:    (9*(Cs+Cc), Cout) bf16 conv weight, taps flattened (dy*3+dx, cin)
    scale_ref/bias_ref: (1, Cout) f32  folded BatchNorm affine (eval mode)
    pad_scr:  VMEM (H+2, W+2, Cs+Cc) f32 scratch for the halo'd input
    returns:  (H*W, Cout) f32, post-ReLU
    """
    H, W, Cs = skip_ref.shape[1], skip_ref.shape[2], skip_ref.shape[3]
    Cc = cur_ref.shape[2]

    # (1) 2x bilinear upsample of the coarse map: one MXU matmul.
    up = jnp.dot(u2_ref[...], cur_ref[0],
                 preferred_element_type=jnp.float32)          # (H*W, Cc)
    up = up.reshape(H, W, Cc)

    # (2) channel concat + 1-px zero halo, all in VMEM (never hits HBM).
    pad_scr[...] = jnp.zeros_like(pad_scr)
    pad_scr[1:H + 1, 1:W + 1, :] = jnp.concatenate(
        [skip_ref[0], up], axis=-1)

    # (3) im2col: 9 shifted taps -> one (H*W, 9*Ct) slab -> single bf16 matmul.
    taps = [pad_scr[dy:dy + H, dx:dx + W, :]
            for dy in range(3) for dx in range(3)]
    patches = jnp.concatenate(taps, axis=-1).reshape(H * W, w_ref.shape[0])
    acc = jnp.dot(patches.astype(jnp.bfloat16), w_ref[...],
                  preferred_element_type=jnp.float32)         # (H*W, Cout)

    # (4) folded BatchNorm + ReLU epilogue.
    y = acc * scale_ref[...] + bias_ref[...]
    return jnp.maximum(y, 0.0)


def _level_kernel(skip_ref, cur_ref, u2_ref, w_ref, scale_ref, bias_ref,
                  o_ref, pad_scr):
    H, W, Cout = o_ref.shape[1], o_ref.shape[2], o_ref.shape[3]
    y = _fused_block_body(skip_ref, cur_ref, u2_ref, w_ref, scale_ref,
                          bias_ref, pad_scr)
    o_ref[...] = y.reshape(1, H, W, Cout).astype(o_ref.dtype)


def _final_level_kernel(skip_ref, cur_ref, u2_ref, w_ref, scale_ref, bias_ref,
                        wl_ref, bl_ref, u4_ref, o_ref, pad_scr):
    # Last decoder level: conv/BN/ReLU + fused 1x1 logit conv + 4x bilinear up.
    H4, W4, out_nc = o_ref.shape[1], o_ref.shape[2], o_ref.shape[3]
    y = _fused_block_body(skip_ref, cur_ref, u2_ref, w_ref, scale_ref,
                          bias_ref, pad_scr)                  # (H*W, Cout)
    # 1x1 "logit" conv on the already-resident tile.
    logit = jnp.dot(y, wl_ref[...],
                    preferred_element_type=jnp.float32) + bl_ref[...]  # (H*W, out_nc)
    # 4x bilinear upsample as one matmul with the flattened operator.
    mask = jnp.dot(u4_ref[...], logit,
                   preferred_element_type=jnp.float32)        # (H4*W4, out_nc)
    o_ref[...] = mask.reshape(1, H4, W4, out_nc).astype(o_ref.dtype)


# --------------------------------------------------------------------------
# Pallas wrappers
# --------------------------------------------------------------------------
_COMPILER_PARAMS = pltpu.CompilerParams(
    dimension_semantics=("parallel",),           # batch axis over TensorCores
    vmem_limit_bytes=48 * 1024 * 1024,
)


def decoder_level(skip, cur, conv_w, conv_scale, conv_bias):
    """One decoder level: fmaps[i-1] = ReLU(BN(conv3x3(cat[skip, up2(cur)])))."""
    N, H, W, Cs = skip.shape
    _, h, w_, Cc = cur.shape
    Ct = Cs + Cc
    Cout = conv_w.shape[-1]

    cur2 = cur.reshape(N, h * w_, Cc)                     # flatten coarse spatial
    u2 = _bilinear_matrix_2d((h, w_), (H, W))             # (H*W, h*w)
    w9 = conv_w.reshape(9 * Ct, Cout).astype(jnp.bfloat16)
    scale2 = conv_scale.reshape(1, Cout).astype(jnp.float32)
    bias2 = conv_bias.reshape(1, Cout).astype(jnp.float32)

    return pl.pallas_call(
        _level_kernel,
        out_shape=jax.ShapeDtypeStruct((N, H, W, Cout), jnp.float32),
        grid=(N,),
        in_specs=[
            pl.BlockSpec((1, H, W, Cs), lambda n: (n, 0, 0, 0)),
            pl.BlockSpec((1, h * w_, Cc), lambda n: (n, 0, 0)),
            pl.BlockSpec((H * W, h * w_), lambda n: (0, 0)),
            pl.BlockSpec((9 * Ct, Cout), lambda n: (0, 0)),
            pl.BlockSpec((1, Cout), lambda n: (0, 0)),
            pl.BlockSpec((1, Cout), lambda n: (0, 0)),
        ],
        out_specs=pl.BlockSpec((1, H, W, Cout), lambda n: (n, 0, 0, 0)),
        scratch_shapes=[pltpu.VMEM((H + 2, W + 2, Ct), jnp.float32)],
        compiler_params=_COMPILER_PARAMS,
    )(skip, cur2, u2, w9, scale2, bias2)


def decoder_final_level(skip, cur, conv_w, conv_scale, conv_bias,
                        logit_w, logit_b, up_factor=4):
    """Last level + fused 1x1 logit conv + fused 4x bilinear upsample (NCHW out)."""
    N, H, W, Cs = skip.shape
    _, h, w_, Cc = cur.shape
    Ct = Cs + Cc
    Cout = conv_w.shape[-1]
    out_nc = logit_w.shape[-1]
    H4, W4 = up_factor * H, up_factor * W

    cur2 = cur.reshape(N, h * w_, Cc)
    u2 = _bilinear_matrix_2d((h, w_), (H, W))             # (H*W, h*w)
    u4 = _bilinear_matrix_2d((H, W), (H4, W4))            # (H4*W4, H*W)
    w9 = conv_w.reshape(9 * Ct, Cout).astype(jnp.bfloat16)
    scale2 = conv_scale.reshape(1, Cout).astype(jnp.float32)
    bias2 = conv_bias.reshape(1, Cout).astype(jnp.float32)
    wl = logit_w.astype(jnp.float32)                      # (Cout, out_nc)
    bl = logit_b.reshape(1, out_nc).astype(jnp.float32)

    out_nhwc = pl.pallas_call(
        _final_level_kernel,
        out_shape=jax.ShapeDtypeStruct((N, H4, W4, out_nc), jnp.float32),
        grid=(N,),
        in_specs=[
            pl.BlockSpec((1, H, W, Cs), lambda n: (n, 0, 0, 0)),
            pl.BlockSpec((1, h * w_, Cc), lambda n: (n, 0, 0)),
            pl.BlockSpec((H * W, h * w_), lambda n: (0, 0)),
            pl.BlockSpec((9 * Ct, Cout), lambda n: (0, 0)),
            pl.BlockSpec((1, Cout), lambda n: (0, 0)),
            pl.BlockSpec((1, Cout), lambda n: (0, 0)),
            pl.BlockSpec((Cout, out_nc), lambda n: (0, 0)),
            pl.BlockSpec((1, out_nc), lambda n: (0, 0)),
            pl.BlockSpec((H4 * W4, H * W), lambda n: (0, 0)),
        ],
        out_specs=pl.BlockSpec((1, H4, W4, out_nc), lambda n: (n, 0, 0, 0)),
        scratch_shapes=[pltpu.VMEM((H + 2, W + 2, Ct), jnp.float32)],
        compiler_params=_COMPILER_PARAMS,
    )(skip, cur2, u2, w9, scale2, bias2, wl, bl, u4)
    # TODO(synk): out_nc(=1) sits on the lane axis for this store; a W-on-lanes
    # epilogue layout would make the final store lane-dense for big masks.
    return jnp.transpose(out_nhwc, (0, 3, 1, 2))          # -> NCHW


# --------------------------------------------------------------------------
# Parameters (deterministic, synthetic)
# --------------------------------------------------------------------------
def init_params(key, encoder_dims, output_nc=1):
    # TODO(synk): BatchNorm is folded in eval mode (running_mean=0, running_var=1);
    # train-mode batch statistics are not computed here.
    eps = 1e-5
    params = {"convs": []}
    for i in range(1, len(encoder_dims)):
        cin = encoder_dims[i] + encoder_dims[i - 1]
        cout = encoder_dims[i - 1]
        key, k1, k2, k3 = jax.random.split(key, 4)
        w = jax.random.normal(k1, (3, 3, cin, cout), jnp.float32) * 0.1
        gamma = 1.0 + 0.1 * jax.random.normal(k2, (cout,), jnp.float32)
        beta = 0.1 * jax.random.normal(k3, (cout,), jnp.float32)
        running_mean = jnp.zeros((cout,), jnp.float32)
        running_var = jnp.ones((cout,), jnp.float32)
        scale = gamma / jnp.sqrt(running_var + eps)
        bias = beta - running_mean * scale
        params["convs"].append({"w": w, "scale": scale, "bias": bias})
    key, k1, k2 = jax.random.split(key, 3)
    params["logit_w"] = jax.random.normal(
        k1, (encoder_dims[0], output_nc), jnp.float32) * 0.1
    params["logit_b"] = 0.1 * jax.random.normal(k2, (output_nc,), jnp.float32)
    return params


# --------------------------------------------------------------------------
# Decoder2D forward (NCHW in / NCHW out, matching the PyTorch module)
# --------------------------------------------------------------------------
def decoder2d_forward(feature_maps_nchw, params):
    assert len(feature_maps_nchw) >= 2
    # Input layout conversion kept in plain JAX glue (boundary only).
    fmaps = [jnp.transpose(f, (0, 2, 3, 1)) for f in feature_maps_nchw]  # NHWC
    n = len(fmaps)
    for i in range(n - 1, 1, -1):                     # intermediate levels
        p = params["convs"][i - 1]
        fmaps[i - 1] = decoder_level(fmaps[i - 1], fmaps[i],
                                     p["w"], p["scale"], p["bias"])
    p = params["convs"][0]                            # last level (+logit+up4)
    return decoder_final_level(fmaps[0], fmaps[1], p["w"], p["scale"],
                               p["bias"], params["logit_w"], params["logit_b"])


# --------------------------------------------------------------------------
if __name__ == "__main__":
    encoder_dims = [4, 8, 16]
    N, base, output_nc = 2, 16, 1

    key = jax.random.PRNGKey(0)
    key, *ks = jax.random.split(key, len(encoder_dims) + 1)
    # feature_maps[i]: (N, encoder_dims[i], base/2^i, base/2^i), NCHW like PyTorch
    feature_maps = [
        jax.random.normal(
            ks[i],
            (N, encoder_dims[i], base // (2 ** i), base // (2 ** i)),
            jnp.float32,
        )
        for i in range(len(encoder_dims))
    ]

    params = init_params(jax.random.PRNGKey(1), encoder_dims, output_nc)

    out = decoder2d_forward(feature_maps, params)
    out = jax.block_until_ready(out)
    assert out.shape == (N, output_nc, base * 4, base * 4), out.shape
    assert bool(jnp.all(jnp.isfinite(out)))
    print("KERNEL_OK")
</pallas_src>

<mosaic_0001>
module attributes {stable_mosaic.version = 11 : i64} {
  func.func @_level_kernel(%arg0: i32, %arg1: memref<1x8x8x8xf32, #tpu.memory_space<vmem>>, %arg2: memref<1x16x16xf32, #tpu.memory_space<vmem>>, %arg3: memref<64x16xf32, #tpu.memory_space<vmem>>, %arg4: memref<216x8xbf16, #tpu.memory_space<vmem>>, %arg5: memref<1x8xf32, #tpu.memory_space<vmem>>, %arg6: memref<1x8xf32, #tpu.memory_space<vmem>>, %arg7: memref<1x8x8x8xf32, #tpu.memory_space<vmem>>, %arg8: memref<10x10x24xf32, #tpu.memory_space<vmem>>) attributes {dimension_semantics = [#tpu.dimension_semantics<parallel>], iteration_bounds = array<i64: 2>, scalar_prefetch = 0 : i64, scratch_operands = 1 : i64, tpu.core_type = #tpu.core_type<tc>, window_params = [{transform_indices = @transform_0, window_bounds = array<i64: 1, 8, 8, 8>}, {transform_indices = @transform_1, window_bounds = array<i64: 1, 16, 16>}, {pipeline_mode = #tpu.pipeline_mode<synchronous>, transform_indices = @transform_2, window_bounds = array<i64: 64, 16>}, {pipeline_mode = #tpu.pipeline_mode<synchronous>, transform_indices = @transform_3, window_bounds = array<i64: 216, 8>}, {pipeline_mode = #tpu.pipeline_mode<synchronous>, transform_indices = @transform_4, window_bounds = array<i64: 1, 8>}, {pipeline_mode = #tpu.pipeline_mode<synchronous>, transform_indices = @transform_5, window_bounds = array<i64: 1, 8>}, {transform_indices = @transform_6, window_bounds = array<i64: 1, 8, 8, 8>}]} {
    %c0 = arith.constant 0 : index
    %c0_0 = arith.constant 0 : index
    %0 = vector.load %arg3[%c0, %c0_0] : memref<64x16xf32, #tpu.memory_space<vmem>>, vector<64x16xf32>
    %c0_1 = arith.constant 0 : index
    %c0_2 = arith.constant 0 : index
    %c0_3 = arith.constant 0 : index
    %1 = vector.load %arg2[%c0_1, %c0_2, %c0_3] : memref<1x16x16xf32, #tpu.memory_space<vmem>>, vector<1x16x16xf32>
    %2 = vector.shape_cast %1 : vector<1x16x16xf32> to vector<16x16xf32>
    %cst = arith.constant dense<0.000000e+00> : vector<64x16xf32>
    %3 = tpu.matmul %0, %2, %cst {dimension_numbers = #tpu.dot_dimension_numbers<[1], [0], [0], [1], [0, 0, 1, 1], [], []>} : vector<64x16xf32>, vector<16x16xf32>, vector<64x16xf32> -> vector<64x16xf32>
    %4 = vector.shape_cast %3 : vector<64x16xf32> to vector<8x8x16xf32>
    %cst_4 = arith.constant 0.000000e+00 : f32
    %5 = vector.broadcast %cst_4 : f32 to vector<10x10x24xf32>
    %c0_5 = arith.constant 0 : index
    %c0_6 = arith.constant 0 : index
    %c0_7 = arith.constant 0 : index
    %6 = vector.load %arg8[%c0_5, %c0_6, %c0_7] : memref<10x10x24xf32, #tpu.memory_space<vmem>>, vector<10x10x24xf32>
    tpu.vector_store %arg8[%c0_5, %c0_6, %c0_7], %5 {strides = array<i32>} : memref<10x10x24xf32, #tpu.memory_space<vmem>>, vector<10x10x24xf32>,
    %c0_8 = arith.constant 0 : index
    %c0_9 = arith.constant 0 : index
    %c0_10 = arith.constant 0 : index
    %c0_11 = arith.constant 0 : index
    %7 = vector.load %arg1[%c0_8, %c0_9, %c0_10, %c0_11] : memref<1x8x8x8xf32, #tpu.memory_space<vmem>>, vector<1x8x8x8xf32>
    %8 = vector.shape_cast %7 : vector<1x8x8x8xf32> to vector<8x8x8xf32>
    %9 = tpu.concatenate %8, %4 in 2 : vector<8x8x8xf32>, vector<8x8x16xf32> -> vector<8x8x24xf32>
    %c1 = arith.constant 1 : index
    %c1_12 = arith.constant 1 : index
    %c0_13 = arith.constant 0 : index
    %10 = vector.load %arg8[%c1, %c1_12, %c0_13] : memref<10x10x24xf32, #tpu.memory_space<vmem>>, vector<8x8x24xf32>
    tpu.vector_store %arg8[%c1, %c1_12, %c0_13], %9 {strides = array<i32>} : memref<10x10x24xf32, #tpu.memory_space<vmem>>, vector<8x8x24xf32>,
    %c0_14 = arith.constant 0 : index
    %c0_15 = arith.constant 0 : index
    %c0_16 = arith.constant 0 : index
    %11 = vector.load %arg8[%c0_14, %c0_15, %c0_16] : memref<10x10x24xf32, #tpu.memory_space<vmem>>, vector<8x8x24xf32>
    %c0_17 = arith.constant 0 : index
    %c1_18 = arith.constant 1 : index
    %c0_19 = arith.constant 0 : index
    %12 = vector.load %arg8[%c0_17, %c1_18, %c0_19] : memref<10x10x24xf32, #tpu.memory_space<vmem>>, vector<8x8x24xf32>
    %c0_20 = arith.constant 0 : index
    %c2 = arith.constant 2 : index
    %c0_21 = arith.constant 0 : index
    %13 = vector.load %arg8[%c0_20, %c2, %c0_21] : memref<10x10x24xf32, #tpu.memory_space<vmem>>, vector<8x8x24xf32>
    %c1_22 = arith.constant 1 : index
    %c0_23 = arith.constant 0 : index
    %c0_24 = arith.constant 0 : index
    %14 = vector.load %arg8[%c1_22, %c0_23, %c0_24] : memref<10x10x24xf32, #tpu.memory_space<vmem>>, vector<8x8x24xf32>
    %c1_25 = arith.constant 1 : index
    %c1_26 = arith.constant 1 : index
    %c0_27 = arith.constant 0 : index
    %15 = vector.load %arg8[%c1_25, %c1_26, %c0_27] : memref<10x10x24xf32, #tpu.memory_space<vmem>>, vector<8x8x24xf32>
    %c1_28 = arith.constant 1 : index
    %c2_29 = arith.constant 2 : index
    %c0_30 = arith.constant 0 : index
    %16 = vector.load %arg8[%c1_28, %c2_29, %c0_30] : memref<10x10x24xf32, #tpu.memory_space<vmem>>, vector<8x8x24xf32>
    %c2_31 = arith.constant 2 : index
    %c0_32 = arith.constant 0 : index
    %c0_33 = arith.constant 0 : index
    %17 = vector.load %arg8[%c2_31, %c0_32, %c0_33] : memref<10x10x24xf32, #tpu.memory_space<vmem>>, vector<8x8x24xf32>
    %c2_34 = arith.constant 2 : index
    %c1_35 = arith.constant 1 : index
    %c0_36 = arith.constant 0 : index
    %18 = vector.load %arg8[%c2_34, %c1_35, %c0_36] : memref<10x10x24xf32, #tpu.memory_space<vmem>>, vector<8x8x24xf32>
    %c2_37 = arith.constant 2 : index
    %c2_38 = arith.constant 2 : index
    %c0_39 = arith.constant 0 : index
    %19 = vector.load %arg8[%c2_37, %c2_38, %c0_39] : memref<10x10x24xf32, #tpu.memory_space<vmem>>, vector<8x8x24xf32>
    %20 = tpu.concatenate %11, %12, %13, %14, %15, %16, %17, %18, %19 in 2 : vector<8x8x24xf32>, vector<8x8x24xf32>, vector<8x8x24xf32>, vector<8x8x24xf32>, vector<8x8x24xf32>, vector<8x8x24xf32>, vector<8x8x24xf32>, vector<8x8x24xf32>, vector<8x8x24xf32> -> vector<8x8x216xf32>
    %21 = vector.shape_cast %20 : vector<8x8x216xf32> to vector<64x216xf32>
    %22 = arith.truncf %21 : vector<64x216xf32> to vector<64x216xbf16>
    %c0_40 = arith.constant 0 : index
    %c0_41 = arith.constant 0 : index
    %23 = vector.load %arg4[%c0_40, %c0_41] : memref<216x8xbf16, #tpu.memory_space<vmem>>, vector<216x8xbf16>
    %cst_42 = arith.constant dense<0.000000e+00> : vector<64x8xf32>
    %24 = tpu.matmul %22, %23, %cst_42 {dimension_numbers = #tpu.dot_dimension_numbers<[1], [0], [0], [1], [0, 0, 1, 1], [], []>} : vector<64x216xbf16>, vector<216x8xbf16>, vector<64x8xf32> -> vector<64x8xf32>
    %c0_43 = arith.constant 0 : index
    %c0_44 = arith.constant 0 : index
    %25 = vector.load %arg5[%c0_43, %c0_44] : memref<1x8xf32, #tpu.memory_space<vmem>>, vector<1x8xf32>
    %26 = vector.broadcast %25 : vector<1x8xf32> to vector<64x8xf32>
    %27 = arith.mulf %24, %26 : vector<64x8xf32>
    %c0_45 = arith.constant 0 : index
    %c0_46 = arith.constant 0 : index
    %28 = vector.load %arg6[%c0_45, %c0_46] : memref<1x8xf32, #tpu.memory_space<vmem>>, vector<1x8xf32>
    %29 = vector.broadcast %28 : vector<1x8xf32> to vector<64x8xf32>
    %30 = arith.addf %27, %29 : vector<64x8xf32>
    %cst_47 = arith.constant 0.000000e+00 : f32
    %31 = vector.broadcast %cst_47 : f32 to vector<64x8xf32>
    %32 = arith.maximumf %30, %31 : vector<64x8xf32>
    %33 = vector.shape_cast %32 : vector<64x8xf32> to vector<1x8x8x8xf32>
    %c0_48 = arith.constant 0 : index
    %c0_49 = arith.constant 0 : index
    %c0_50 = arith.constant 0 : index
    %c0_51 = arith.constant 0 : index
    %34 = vector.load %arg7[%c0_48, %c0_49, %c0_50, %c0_51] : memref<1x8x8x8xf32, #tpu.memory_space<vmem>>, vector<1x8x8x8xf32>
    tpu.vector_store %arg7[%c0_48, %c0_49, %c0_50, %c0_51], %33 {strides = array<i32>} : memref<1x8x8x8xf32, #tpu.memory_space<vmem>>, vector<1x8x8x8xf32>,
    return
  }
  func.func @transform_0(%arg0: i32) -> (i32, i32, i32, i32) {
    %c0_i32 = arith.constant 0 : i32
    %c0_i32_0 = arith.constant 0 : i32
    %c0_i32_1 = arith.constant 0 : i32
    %c0_i32_2 = arith.constant 0 : i32
    return %arg0, %c0_i32, %c0_i32_0, %c0_i32_1 : i32, i32, i32, i32
  }
  func.func @transform_1(%arg0: i32) -> (i32, i32, i32) {
    %c0_i32 = arith.constant 0 : i32
    %c0_i32_0 = arith.constant 0 : i32
    %c0_i32_1 = arith.constant 0 : i32
    return %arg0, %c0_i32, %c0_i32_0 : i32, i32, i32
  }
  func.func @transform_2(%arg0: i32) -> (i32, i32) {
    %c0_i32 = arith.constant 0 : i32
    %c0_i32_0 = arith.constant 0 : i32
    %c0_i32_1 = arith.constant 0 : i32
    return %c0_i32, %c0_i32_0 : i32, i32
  }
  func.func @transform_3(%arg0: i32) -> (i32, i32) {
    %c0_i32 = arith.constant 0 : i32
    %c0_i32_0 = arith.constant 0 : i32
    %c0_i32_1 = arith.constant 0 : i32
    return %c0_i32, %c0_i32_0 : i32, i32
  }
  func.func @transform_4(%arg0: i32) -> (i32, i32) {
    %c0_i32 = arith.constant 0 : i32
    %c0_i32_0 = arith.constant 0 : i32
    %c0_i32_1 = arith.constant 0 : i32
    return %c0_i32, %c0_i32_0 : i32, i32
  }
  func.func @transform_5(%arg0: i32) -> (i32, i32) {
    %c0_i32 = arith.constant 0 : i32
    %c0_i32_0 = arith.constant 0 : i32
    %c0_i32_1 = arith.constant 0 : i32
    return %c0_i32, %c0_i32_0 : i32, i32
  }
  func.func @transform_6(%arg0: i32) -> (i32, i32, i32, i32) {
    %c0_i32 = arith.constant 0 : i32
    %c0_i32_0 = arith.constant 0 : i32
    %c0_i32_1 = arith.constant 0 : i32
    %c0_i32_2 = arith.constant 0 : i32
    return %arg0, %c0_i32, %c0_i32_0, %c0_i32_1 : i32, i32, i32, i32
  }
}

</mosaic_0001>

<bundles_post_ra>
// kernel: tpu_custom_call.1
= control target key start
LH: loop header
LB: loop body
LE: loop exit
PB: predicated region body
PF: predicated region fallthrough
CT: control target
= control target key end

     0   :  { %11 = vsyncpa [#allocation4], 0  ;;  %s2203_s0 = inlined_call_operand.vmem [shape: f32[2,8,8,8], index: 0, kind: input, shape index: {}]   ;;  %s2204_s1 = inlined_call_operand.vmem [shape: f32[2,16,16], index: 1, kind: input, shape index: {}]   ;;  %s2205_s2 = inlined_call_operand.vmem [shape: f32[64,16], index: 2, kind: input, shape index: {}]   ;;  %s2206_s3 = inlined_call_operand.vmem [shape: bf16[216,8], index: 3, kind: input, shape index: {}]   ;;  %s2207_s4 = inlined_call_operand.vmem [shape: f32[1,8], index: 4, kind: input, shape index: {}]   ;;  %s2208_s5 = inlined_call_operand.vmem [shape: f32[1,8], index: 5, kind: input, shape index: {}]   ;;  %s2209_s6 = inlined_call_operand.hbm [shape: f32[2,8,8,8], index: 6, kind: output, shape index: {}]  }
   0x1   :  { %13 = vsyncpa [#allocation4 + $0x1], 0  ;;  %s1656_s21 = smov 0   ;;  %s1658_s22 = smov 0  }
   0x2   :  { %s1660_s23 = smov 0   ;;  %s1662_s24 = smov 0  }
   0x3 LB: > { %s1677_s25 = sadd.s32 4294967295, %s1606_s24   ;;  %s1222_s26 = sadd.s32 4294967294, %s1606_s24   ;;  %s1606_s24 = sphi %s1662_s24, %s2215_s24   ;;  %s1602_s23 = sphi %s1660_s23, %s2214_s23   ;;  %s1598_s22 = sphi %s1658_s22, %s2213_s22   ;;  %s1594_s21 = sphi %s1656_s21, %s2212_s21  }
   0x4   : > { %s1681_s27 = sadd.s32 1, %s1606_s24   ;;  %s162_s28 = sadd.s32 1, %s1602_s23 }
   0x5   : > { %s159_s29 = ssub.s32 %s1606_s24, %s1681_s27  ;;  %p172_p0 = scmp.ne.s32.totalorder %s1602_s23, %s1598_s22 }
   0x6   : > { %p160_p1 = scmp.eq.s32.totalorder %s159_s29, 0  ;;  %p173_p2 = scmp.eq.s32.totalorder %s1677_s25, 1 }
   0x7   : > { %p178_p3 = scmp.ne.s32.totalorder %s1598_s22, %s1594_s21  ;;  %p179_p4 = scmp.eq.s32.totalorder %s1222_s26, 1 }
   0x8   : > { %s1692_s30 = scalar_select %p160_p1, %s1602_s23, %s162_s28  }
   0x9   : > { %p1694_p5 = por %p173_p2, %p172_p0  ;;  %p1698_p6 = por %p179_p4, %p178_p3 }
   0xa   : > { %p1225_p7 = scmp.ge.s32.totalorder %s1606_s24, 1  ;;  %p225_p8 = scmp.lt.s32.totalorder %s1606_s24, 3 }
   0xc   : > { %p226_p9 = pnand %p1225_p7, %p225_p8 }
   0xd   : > { %p260_p10 = scmp.lt.s32.totalorder (!%p226_p9), %s1677_s25, 1  ;;  %s1609_s16 = smov (!%p226_p9), 8  }
   0xe   : > { %229 = sbr.rel (%p226_p9) target bundleno = 759 (0x2f7), region = 44  ;;  %s1611_s26 = smov (!%p226_p9), 48  }
   0xf   : > { %s1613_s13 = smov (!%p226_p9), 40   ;;  %s1615_s17 = smov (!%p226_p9), 64  }
  0x10   : > { %s1616_s20 = smov (!%p226_p9), 120   ;;  %s1617_s9 = smov (!%p226_p9), 72  }
  0x11   : > { %s1618_s19 = smov (!%p226_p9), 96   ;;  %s1266_s29 = sshll.u32 (!%p226_p9), %s1677_s25, 10 }
  0x13   : > { %v271_v0 = vld [vmem:[%s2205_s2] sm:$0xff]  ;;  %vm281_vm0 = vcmask 130048   ;;  %s1710_s11 = scalar_select %p260_p10, %s1677_s25, 1  ;;  %v272_v3 = vld [vmem:[%s2205_s2 + $0x8] sm:$0xff]  ;;  %v273_v4 = vld [vmem:[%s2205_s2 + $0x10] sm:$0xff]  ;;  %vm411_vm1 = vcmask 195584  }
  0x14   : > { %1281 = vmatprep.mubr.msk.f32.mxu0 %vm281_vm0, %v271_v0  ;;  %v274_v5 = vld [vmem:[%s2205_s2 + $0x18] sm:$0xff]  ;;  %v275_v6 = vld [vmem:[%s2205_s2 + $0x20] sm:$0xff]  ;;  %v276_v7 = vld [vmem:[%s2205_s2 + $0x28] sm:$0xff]  ;;  %vm413_vm2 = vcmask 189440   ;;  %v1608_v10 = vmov 0.0   ;;  %v1610_v20 = vmov 0  }
  0x15   : > { %s1265_s12 = sshll.u32 %s1710_s11, 4  ;;  %v277_v8 = vld [vmem:[%s2205_s2 + $0x30] sm:$0xff]  ;;  %v278_v9 = vld [vmem:[%s2205_s2 + $0x38] sm:$0xff]  ;;  %417 = vst.msk [vmem:[#allocation2 + $0x20] sm:$0xff] %vm411_vm1, %v1608_v10  ;;  %412 = vst.msk [vmem:[#allocation2] sm:$0xff] %vm411_vm1, %v1608_v10  ;;  %1293 = vmatprep.subr.bf16.mxu1 %v1610_v20  ;;  %s1264_s10 = sshll.u32 %s1710_s11, 6 }
  0x16   : > { %s269_s15 = scalar_lea.vmem %s2204_s1, %s1265_s12  ;;  %418 = vst.msk [vmem:[#allocation2 + $0x28] sm:$0x3] %vm413_vm2, %v1608_v10  ;;  %414 = vst.msk [vmem:[#allocation2 + $0x8] sm:$0x3] %vm413_vm2, %v1608_v10  ;;  %v1532_v19 = vld [vmem:[%s2206_s3 + $0x38] sm:$0xff]   ;;  %v1533_v21 = vld [vmem:[%s2206_s3 + $0x30] sm:$0xff]   ;;  %s1798_s14 = scalar_lea.vmem %s2203_s0, %s1264_s10 }
  0x17   : > { %v280_v1 = vld [vmem:[%s269_s15 + $0x8] sm:$0xff]  ;;  %v279_v2 = vld [vmem:[%s269_s15] sm:$0xff]  ;;  %415 = vst.msk [vmem:[#allocation2 + $0x10] sm:$0xff] %vm411_vm1, %v1608_v10  ;;  %419 = vst.msk [vmem:[#allocation2 + $0x30] sm:$0xff] %vm411_vm1, %v1608_v10  ;;  %1307 = vmatpush1.bf16.msra.mxu1 %v1532_v19  ;;  %vm473_vm3 = vcmask 64512   ;;  %vm1019_vm4 = vcmask 1043456   ;;  %s2152_s15 = scalar_lea.hbm %s2209_s6, %s1266_s29 }
  0x18   : > { %1277 = vmatprep.subr.mxu0 %v280_v1  ;;  %416 = vst.msk [vmem:[#allocation2 + $0x18] sm:$0x3] %vm413_vm2, %v1608_v10  ;;  %420 = vst.msk [vmem:[#allocation2 + $0x38] sm:$0x3] %vm413_vm2, %v1608_v10  ;;  %1294 = vmatprep.subr.bf16.mxu1 %v1610_v20  ;;  %v1534_v22 = vld [vmem:[%s2206_s3 + $0x28] sm:$0xff]   ;;  %v1535_v23 = vld [vmem:[%s2206_s3 + $0x20] sm:$0xff]  }
  0x19   : > { %1278 = vmatpush3.msra.mxu0 %v280_v1  ;;  %421 = vst.msk [vmem:[#allocation2 + $0x40] sm:$0xff] %vm411_vm1, %v1608_v10  ;;  %423 = vst.msk [vmem:[#allocation2 + $0x50] sm:$0xff] %vm411_vm1, %v1608_v10  ;;  %v434_v24 = vld [vmem:[%s1798_s14 + $0x8] sm:$0xff]  ;;  %v436_v27 = vld [vmem:[%s1798_s14 + $0x18] sm:$0xff]  ;;  %s1612_s12 = smov 16   ;;  %vm872_vm5 = vcmask 326656  }
  0x1a   : > { %1279 = vmatprep.subr.mxu0 %v279_v2  ;;  %422 = vst.msk [vmem:[#allocation2 + $0x48] sm:$0x3] %vm413_vm2, %v1608_v10  ;;  %424 = vst.msk [vmem:[#allocation2 + $0x58] sm:$0x3] %vm413_vm2, %v1608_v10  ;;  %v435_v29 = vld [vmem:[%s1798_s14 + $0x10] sm:$0xff]  ;;  %v1536_v31 = vld [vmem:[%s2206_s3 + $0x18] sm:$0xff]  }
  0x1b   : > { %1280 = vmatpush3.msra.mxu0 %v279_v2  ;;  %425 = vst.msk [vmem:[#allocation2 + $0x60] sm:$0xff] %vm411_vm1, %v1608_v10  ;;  %427 = vst.msk [vmem:[#allocation2 + $0x70] sm:$0xff] %vm411_vm1, %v1608_v10  ;;  %1308 = vmatpush1.bf16.msra.mxu1 %v1533_v21  ;;  %v438_v34 = vld [vmem:[%s1798_s14 + $0x28] sm:$0xff]  ;;  %v437_v35 = vld [vmem:[%s1798_s14 + $0x20] sm:$0xff]  ;;  %vm881_vm6 = vcmask 523264   ;;  %vm1006_vm7 = vcmask 719872  }
  0x1c   : > { %1282 = vmatmul.mubr.msk.f32.vlgmr.msra.gmra.mxu0 %vm281_vm0, %v272_v3  ;;  %426 = vst.msk [vmem:[#allocation2 + $0x68] sm:$0x3] %vm413_vm2, %v1608_v10  ;;  %428 = vst.msk [vmem:[#allocation2 + $0x78] sm:$0x3] %vm413_vm2, %v1608_v10  ;;  %1023 = vmatprep.subr.bf16.mxu0 %v1610_v20  ;;  %v1537_v38 = vld [vmem:[%s2206_s3 + $0x10] sm:$0xff]   ;;  %v433_v41 = vld [vmem:[%s1798_s14] sm:$0xff] }
  0x1d   : > { %1284 = vmatprep.mubr.msk.f32.mxu0 %vm281_vm0, %v273_v4  ;;  %429 = vst.msk [vmem:[#allocation2 + $0x80] sm:$0xff] %vm411_vm1, %v1608_v10  ;;  %431 = vst.msk [vmem:[#allocation2 + $0x90] sm:$0xff] %vm411_vm1, %v1608_v10  ;;  %1024 = vmatpush1.bf16.msra.mxu0 %v1532_v19  ;;  %v439_v42 = vld [vmem:[%s1798_s14 + $0x30] sm:$0xff]  ;;  %v440_v50 = vld [vmem:[%s1798_s14 + $0x38] sm:$0xff]  ;;  %s1614_s14 = smov 24   ;;  %vm828_vm8 = vcmask 392192  }
  0x1e   : > { %430 = vst.msk [vmem:[#allocation2 + $0x88] sm:$0x3] %vm413_vm2, %v1608_v10  ;;  %432 = vst.msk [vmem:[#allocation2 + $0x98] sm:$0x3] %vm413_vm2, %v1608_v10  ;;  %1025 = vmatprep.subr.bf16.mxu0 %v1610_v20  ;;  %1295 = vmatprep.subr.bf16.mxu1 %v1610_v20  ;;  %v1538_v51 = vld [vmem:[%s2206_s3 + $0x8] sm:$0xff]   ;;  %v1539_v59 = vld [vmem:[%s2206_s3] sm:$0xff]  }
  0x1f   : > { %1309 = vmatpush1.bf16.msra.mxu1 %v1534_v22  ;;  %v499_v57 = vld [vmem:[#allocation2 + $0x1] sm:$0xff]  ;;  %vm837_vm9 = vcmask 588800   ;;  %vm846_vm10 = vcmask 785408   ;;  %vm855_vm11 = vcmask 982016  }
  0x20   : > { %1285 = vmatmul.mubr.msk.f32.gmra.mxu0 %vm281_vm0, %v274_v5  ;;  %1296 = vmatprep.subr.bf16.mxu1 %v1610_v20  ;;  %v1540_v60 = vld [vmem:[%s2206_s3 + $0x68] ss:$0 sps:$4 sm:$0xff]  }
  0x21   : > { %1287 = vmatprep.mubr.msk.f32.mxu0 %vm281_vm0, %v275_v6  ;;  %1026 = vmatpush1.bf16.msra.mxu0 %v1533_v21  ;;  %v1021_v1 = vsel %vm1019_vm4, %v1540_v60, 0  ;;  %v507_v3 = vld [vmem:[#allocation2 + $0x2] sm:$0xff] }
  0x22   : > { %1027 = vmatprep.subr.bf16.mxu0 %v1610_v20 }
  0x23   : > { %1310 = vmatpush1.bf16.msra.mxu1 %v1535_v23 }
  0x24   : > { %1288 = vmatmul.mubr.msk.f32.gmra.mxu0 %vm281_vm0, %v276_v7  ;;  %1297 = vmatprep.subr.bf16.mxu1 %v1610_v20  ;;  %v547_v10 = vld [vmem:[#allocation2 + $0x90] sm:$0xff] }
  0x25   : > { %1290 = vmatprep.mubr.msk.f32.mxu0 %vm281_vm0, %v277_v8  ;;  %1028 = vmatpush1.bf16.msra.mxu0 %v1534_v22  ;;  %v1541_v8 = vld [vmem:[%s2206_s3 + $0x60] sm:$0xff]   ;;  %v555_v19 = vld [vmem:[#allocation2 + $0x91] sm:$0xff] }
  0x26   : > { %1029 = vmatprep.subr.bf16.mxu0 %v1610_v20 }
  0x27   : > { %1311 = vmatpush1.bf16.msra.mxu1 %v1536_v31 }
  0x28   : > { %1291 = vmatmul.mubr.msk.f32.gmra.mxu0 %vm281_vm0, %v278_v9  ;;  %1298 = vmatprep.subr.bf16.mxu1 %v1610_v20 }
  0x29   : > { %1030 = vmatpush1.bf16.msra.mxu0 %v1535_v23  ;;  %v1544_v23 = vld [vmem:[%s2206_s3 + $0x48] sm:$0xff]  }
  0x2a   : > { %1031 = vmatprep.subr.bf16.mxu0 %v1610_v20 }
  0x2b   : > { %1312 = vmatpush1.bf16.msra.mxu1 %v1537_v38 }
  0x2c   : > { %1299 = vmatprep.subr.bf16.mxu1 %v1610_v20 }
  0x2d   : > { %1032 = vmatpush1.bf16.msra.mxu0 %v1536_v31 }
  0x2e   : > { %1033 = vmatprep.subr.bf16.mxu0 %v1610_v20 }
  0x2f   : > { %1313 = vmatpush1.bf16.msra.mxu1 %v1538_v51 }
  0x30   : > { %1300 = vmatprep.subr.bf16.mxu1 %v1610_v20 }
  0x31   : > { %1034 = vmatpush1.bf16.msra.mxu0 %v1537_v38 }
  0x32   : > { %1035 = vmatprep.subr.bf16.mxu0 %v1610_v20 }
  0x33   : > { %1314 = vmatpush1.bf16.msra.mxu1 %v1539_v59 }
  0x34   : > { %1301 = vmatprep.subr.bf16.mxu1 %v1610_v20 }
  0x35   : > { %1036 = vmatpush1.bf16.msra.mxu0 %v1538_v51 }
  0x36   : > { %1037 = vmatprep.subr.bf16.mxu0 %v1610_v20 }
  0x37   : > { %1315 = vmatpush2.bf16.msra.mxu1 %v1021_v1 }
  0x38   : > { %1302 = vmatprep.subr.bf16.mxu1 %v1610_v20 }
  0x39   : > { %1038 = vmatpush1.bf16.msra.mxu0 %v1539_v59 }
  0x3a   : > { %1043 = vmatprep.subr.bf16.mxu0 %v1610_v20 }
  0x3b   : > { %1316 = vmatpush2.bf16.msra.mxu1 %v1541_v8 }
  0x3c   : > { %1303 = vmatprep.subr.bf16.mxu1 %v1610_v20 }
  0x3d   : > { %1044 = vmatpush2.bf16.msra.mxu0 %v1021_v1 }
  0x3e   : > { %1045 = vmatprep.subr.bf16.mxu0 %v1610_v20 }
  0x41   : > { %1046 = vmatpush2.bf16.msra.mxu0 %v1541_v8 }
  0x42   : > { %1047 = vmatprep.subr.bf16.mxu0 %v1610_v20 }
  0xdc   : > { %v1283_v11 = vpop.f32.mrf.mxu0 }
  0xdd   : > { %451 = vrot.lane.b32.xlu0 %v1283_v11, %s1609_s16  ;;  %v1542_v11 = vld [vmem:[%s2206_s3 + $0x58] sm:$0xff]  }
  0xde   : > { %v372_v12 = vpop.f32.mrf.mxu0  ;;  %1317 = vmatpush2.bf16.msra.mxu1 %v1542_v11  ;;  %1048 = vmatpush2.bf16.msra.mxu0 %v1542_v11 }
  0xdf   : > { %1304 = vmatprep.subr.bf16.mxu1 %v1610_v20  ;;  %1049 = vmatprep.subr.bf16.mxu0 %v1610_v20 }
  0xe0   : > { %v1286_v13 = vpop.f32.mrf.mxu0 }
  0xe1   : > { %455 = vrot.lane.b32.xlu1 %v1286_v13, %s1609_s16 }
  0xe2   : > { %v382_v14 = vpop.f32.mrf.mxu0 }
  0xe3   : > { %453 = vrot.lane.b32.xlu0 %v382_v14, %s1609_s16 }
  0xe4   : > { %v1289_v15 = vpop.f32.mrf.mxu0 }
  0xe6   : > { %v392_v16 = vpop.f32.mrf.mxu0 }
  0xe7   : > { %459 = vrot.lane.b32.xlu0 %v1289_v15, %s1609_s16  ;;  %457 = vrot.lane.b32.xlu1 %v392_v16, %s1609_s16  ;;  %v1543_v16 = vld [vmem:[%s2206_s3 + $0x50] sm:$0xff]  }
  0xe8   : > { %v1292_v17 = vpop.f32.mrf.mxu0  ;;  %1318 = vmatpush2.bf16.msra.mxu1 %v1543_v16  ;;  %1050 = vmatpush2.bf16.msra.mxu0 %v1543_v16 }
  0xe9   : > { %1305 = vmatprep.subr.bf16.mxu1 %v1610_v20  ;;  %1051 = vmatprep.subr.bf16.mxu0 %v1610_v20 }
  0xea   : > { %v402_v18 = vpop.f32.mrf.mxu0 }
  0xeb   : > { %449 = vrot.lane.b32.xlu0 %v372_v12, %s1609_s16  ;;  %461 = vrot.lane.b32.xlu1 %v402_v18, %s1609_s16 }
  0xec   : > { %1319 = vmatpush2.bf16.msra.mxu1 %v1544_v23  ;;  %1052 = vmatpush2.bf16.msra.mxu0 %v1544_v23 }
  0xed   : > { %1306 = vmatprep.subr.bf16.mxu1 %v1610_v20  ;;  %1053 = vmatprep.subr.bf16.mxu0 %v1610_v20 }
  0xef   : > { %463 = vrot.lane.b32.xlu1 %v1292_v17, %s1609_s16 }
 0x14f   : > { %v452_v25 = vpop.permute.xlu0 %451 }
 0x150   : > { %v475_v26 = vsel %vm473_vm3, %v434_v24, %v452_v25 }
 0x151   : > { %484 = vst.msk [vmem:[#allocation2 + $0x21] sm:$0xff] %vm411_vm1, %v475_v26 }
 0x153   : > { %v456_v28 = vpop.permute.xlu1 %455 }
 0x154   : > { %v477_v30 = vsel %vm473_vm3, %v436_v27, %v456_v28  ;;  %v1545_v28 = vld [vmem:[%s2206_s3 + $0x40] sm:$0xff]  }
 0x155   : > { %486 = vst.msk [vmem:[#allocation2 + $0x41] sm:$0xff] %vm411_vm1, %v477_v30  ;;  %v454_v32 = vpop.permute.xlu0 %453  ;;  %1320 = vmatpush2.bf16.msra.mxu1 %v1545_v28  ;;  %1054 = vmatpush2.bf16.msra.mxu0 %v1545_v28 }
 0x156   : > { %v476_v33 = vsel %vm473_vm3, %v435_v29, %v454_v32 }
 0x157   : > { %485 = vst.msk [vmem:[#allocation2 + $0x31] sm:$0xff] %vm411_vm1, %v476_v33 }
 0x158   : > { %v1829_v47 = vld [vmem:[#allocation2 + $0x22] sm:$0xff] }
 0x159   : > { %v460_v36 = vpop.permute.xlu0 %459  ;;  %v458_v37 = vpop.permute.xlu1 %457  ;;  %v1901_v15 = vld [vmem:[#allocation2 + $0x20] sm:$0xff] }
 0x15a   : > { %v479_v39 = vsel %vm473_vm3, %v438_v34, %v460_v36  ;;  %v478_v40 = vsel %vm473_vm3, %v437_v35, %v458_v37  ;;  %v501_v22 = vld [vmem:[#allocation2 + $0x21] sm:$0xff] }
 0x15b   : > { %488 = vst.msk [vmem:[#allocation2 + $0x61] sm:$0xff] %vm411_vm1, %v479_v39  ;;  %487 = vst.msk [vmem:[#allocation2 + $0x51] sm:$0xff] %vm411_vm1, %v478_v40 }
 0x15c   : > { %v1845_v53 = vld [vmem:[#allocation2 + $0x40] sm:$0xff] }
 0x15d   : > { %v450_v43 = vpop.permute.xlu0 %449  ;;  %v462_v44 = vpop.permute.xlu1 %461  ;;  %v1864_v61 = vld [vmem:[#allocation2 + $0x41] sm:$0xff] }
 0x15e   : > { %v474_v45 = vsel %vm473_vm3, %v433_v41, %v450_v43  ;;  %v480_v46 = vsel %vm473_vm3, %v439_v42, %v462_v44  ;;  %v1831_v48 = vld [vmem:[#allocation2 + $0x32] sm:$0xff]  ;;  %v558_v5 = vld [vmem:[#allocation2 + $0x42] sm:$0xff] }
 0x15f   : > { %483 = vst.msk [vmem:[#allocation2 + $0x11] sm:$0xff] %vm411_vm1, %v474_v45  ;;  %489 = vst.msk [vmem:[#allocation2 + $0x71] sm:$0xff] %vm411_vm1, %v480_v46  ;;  %v1837_v49 = vpack.i.bf16 %v1831_v48, %v1829_v47  ;;  %v502_v21 = vld [vmem:[#allocation2 + $0x31] sm:$0xff]  ;;  %v1402_v30 = vpack.i.bf16 %v558_v5, %v1831_v48 }
 0x160   : > { %v1392_v25 = vpack.i.bf16 %v502_v21, %v501_v22  ;;  %v1931_v32 = vld [vmem:[#allocation2 + $0x30] sm:$0xff]  ;;  %v1412_v38 = vpack.i.bf16 %v1864_v61, %v502_v21 }
 0x161   : > { %1398 = vrot.lane.b32.xlu1 %v1837_v49, %s1611_s26  ;;  %v464_v52 = vpop.permute.xlu1 %463  ;;  %v1407_v35 = vpack.i.bf16 %v1845_v53, %v1931_v32  ;;  %v1417_v39 = vpack.i.bf16 %v1931_v32, %v1901_v15  ;;  %v563_v46 = vld [vmem:[#allocation2 + $0x92] sm:$0xff] }
 0x162   : > { %v1847_v54 = vld [vmem:[#allocation2 + $0x50] sm:$0xff]  ;;  %v481_v55 = vsel %vm473_vm3, %v440_v50, %v464_v52  ;;  %v1921_v27 = vld [vmem:[#allocation2 + $0x60] sm:$0xff] }
 0x163   : > { %v1427_v56 = vpack.i.bf16 %v1847_v54, %v1845_v53  ;;  %490 = vst.msk [vmem:[#allocation2 + $0x81] sm:$0xff] %vm411_vm1, %v481_v55  ;;  %v1855_v58 = vld [vmem:[#allocation2 + $0x51] sm:$0xff]  ;;  %v552_v33 = vld [vmem:[#allocation2 + $0x61] sm:$0xff]  ;;  %v1457_v45 = vpack.i.bf16 %v1921_v27, %v1847_v54 }
 0x164   : > { %v1870_v63 = vpack.i.bf16 %v1855_v58, %v1864_v61  ;;  %v1874_v2 = vld [vmem:[#allocation2 + $0x52] sm:$0xff]  ;;  %v560_v20 = vld [vmem:[#allocation2 + $0x62] sm:$0xff]  ;;  %v1462_v48 = vpack.i.bf16 %v552_v33, %v1855_v58 }
 0x165   : > { %1428 = vrot.lane.b32.xlu1 %v1427_v56, %s1612_s12  ;;  %v1437_v6 = vpack.i.bf16 %v1874_v2, %v558_v5  ;;  %v1452_v43 = vpack.i.bf16 %v560_v20, %v1874_v2 }
 0x166   : > { %v1866_v62 = vld [vmem:[#allocation2 + $0x11] sm:$0xff] }
 0x167   : > { %v1372_v0 = vpack.i.bf16 %v1866_v62, %v499_v57  ;;  %v508_v4 = vld [vmem:[#allocation2 + $0x12] sm:$0xff]  ;;  %v1467_v50 = vpack.i.bf16 %v501_v22, %v1866_v62 }
 0x168   : > { %v1377_v7 = vpack.i.bf16 %v508_v4, %v507_v3  ;;  %v1382_v12 = vpack.i.bf16 %v1829_v47, %v508_v4  ;;  %v1896_v13 = vld [vmem:[#allocation2 + $0x10] sm:$0xff] }
 0x169   : > { %1433 = vrot.lane.b32.xlu1 %v1870_v63, %s1613_s13  ;;  %1373 = vrot.lane.b32.xlu0 %v1372_v0, %s1614_s14  ;;  %v1387_v17 = vpack.i.bf16 %v1901_v15, %v1896_v13  ;;  %v1917_v26 = vld [vmem:[#allocation2 + $0x70] sm:$0xff] }
 0x16a   : > { %v1888_v9 = vld [vmem:[#allocation2 + $0x80] sm:$0xff]  ;;  %v1482_v29 = vpack.i.bf16 %v1917_v26, %v1921_v27  ;;  %v553_v31 = vld [vmem:[#allocation2 + $0x71] sm:$0xff] }
 0x16b   : > { %v1472_v14 = vpack.i.bf16 %v547_v10, %v1888_v9  ;;  %v554_v18 = vld [vmem:[#allocation2 + $0x81] sm:$0xff]  ;;  %v1487_v34 = vpack.i.bf16 %v553_v31, %v552_v33  ;;  %v561_v36 = vld [vmem:[#allocation2 + $0x72] sm:$0xff]  ;;  %v1512_v42 = vpack.i.bf16 %v1888_v9, %v1917_v26 }
 0x16c   : > { %v1477_v24 = vpack.i.bf16 %v555_v19, %v554_v18  ;;  %v1492_v37 = vpack.i.bf16 %v561_v36, %v560_v20  ;;  %v538_v40 = vld [vmem:[#allocation2 + $0x82] sm:$0xff]  ;;  %v1517_v44 = vpack.i.bf16 %v554_v18, %v553_v31 }
 0x16d   : > { %1438 = vrot.lane.b32.xlu1 %v1437_v6, %s1615_s17  ;;  %1378 = vrot.lane.b32.xlu0 %v1377_v7, %s1611_s26  ;;  %v1507_v41 = vpack.i.bf16 %v538_v40, %v561_v36  ;;  %v1527_v47 = vpack.i.bf16 %v563_v46, %v538_v40 }
 0x171   : > { %1448 = vrot.lane.b32.xlu1 %v1437_v6, %s1611_s26  ;;  %1383 = vrot.lane.b32.xlu0 %v1382_v12, %s1616_s20 }
 0x175   : > { %1473 = vrot.lane.b32.xlu1 %v1472_v14, %s1612_s12  ;;  %1388 = vrot.lane.b32.xlu0 %v1387_v17, %s1617_s9 }
 0x179   : > { %1478 = vrot.lane.b32.xlu1 %v1477_v24, %s1613_s13  ;;  %1393 = vrot.lane.b32.xlu0 %v1392_v25, %s1614_s14 }
 0x17d   : > { %1483 = vrot.lane.b32.xlu1 %v1482_v29, %s1612_s12  ;;  %1403 = vrot.lane.b32.xlu0 %v1402_v30, %s1616_s20 }
 0x181   : > { %1488 = vrot.lane.b32.xlu1 %v1487_v34, %s1613_s13  ;;  %1408 = vrot.lane.b32.xlu0 %v1407_v35, %s1617_s9 }
 0x185   : > { %1493 = vrot.lane.b32.xlu1 %v1492_v37, %s1615_s17  ;;  %1413 = vrot.lane.b32.xlu0 %v1412_v38, %s1618_s19 }
 0x189   : > { %1498 = vrot.lane.b32.xlu1 %v1487_v34, %s1614_s14  ;;  %1418 = vrot.lane.b32.xlu0 %v1417_v39, %s1612_s12 }
 0x18d   : > { %1503 = vrot.lane.b32.xlu1 %v1492_v37, %s1611_s26  ;;  %1423 = vrot.lane.b32.xlu0 %v1392_v25, %s1613_s13  ;;  %s257_s26 = sand.u32 1, %s1598_s22  }
 0x18e   : > { %s2162_s25 = scalar_lea.sflag [#allocation4], %s257_s26 }
 0x191   : > { %1508 = vrot.lane.b32.xlu1 %v1507_v41, %s1616_s20  ;;  %1443 = vrot.lane.b32.xlu0 %v1870_v63, %s1614_s14 }
 0x195   : > { %1513 = vrot.lane.b32.xlu1 %v1512_v42, %s1617_s9  ;;  %1453 = vrot.lane.b32.xlu0 %v1452_v43, %s1616_s20  ;;  %s1226_s20 = sshll.u32 %s257_s26, 6 }
 0x196   : > { %s2133_s28 = scalar_lea.vmem [#allocation3], %s1226_s20 }
 0x199   : > { %1518 = vrot.lane.b32.xlu1 %v1517_v44, %s1618_s19  ;;  %1458 = vrot.lane.b32.xlu0 %v1457_v45, %s1617_s9  ;;  %s1148_s9 = sshll.u32 %s2133_s28, 4  ;;  %s2154_s9 = int_to_ptr.vmem [resolvable:$true] %s1148_s9 }
 0x19a   : > { %s1546_s18 = scalar_lea.vmem %s2154_s9, 1024 }
 0x19b   : > { %p1547_p11 = scmp.ne.s32.totalorder %s2154_s9, %s1546_s18 }
 0x19d   : > { %1528 = vrot.lane.b32.xlu1 %v1527_v47, %s1615_s17  ;;  %1463 = vrot.lane.b32.xlu0 %v1462_v48, %s1618_s19  ;;  %v491_v47 = vld [vmem:[#allocation2] sm:$0xff]  ;;  %p1548_p12 = pnand %p1547_p11, %p1694_p5 }
 0x19f   : > { %p1549_p13 = pneg %p1548_p12 }
 0x1a1   : > { %1468 = vrot.lane.b32.xlu0 %v1467_v50, %s1618_s19  ;;  %s1619_s19 = smov [#allocation3]  }
 0x1a2   : > { %s1550_s12 = sshll.u32 %s1619_s19, 4  ;;  %s1551_s12 = int_to_ptr.vmem [resolvable:$false] %s1550_s12 }
 0x1a3   : > { %s1552_s13 = scalar_lea.vmem %s1551_s12, 2048  ;;  %p1553_p0 = scmp.lt.s32.totalorder %s2154_s9, %s1551_s12 }
 0x1a4   : > { %p1554_p1 = scmp.lt.s32.totalorder %s1552_s13, %s1546_s18 }
 0x1a5   : > { %1523 = vrot.lane.b32.xlu0 %v1837_v49, %s1615_s17 }
 0x1a6   : > { %p1555_p2 = por %p1554_p1, %p1553_p0 }
 0x1a8   : > { %p1556_p3 = pnand %p1555_p2, %p1549_p13 }
 0x1d3   : > { %v1399_v51 = vpop.permute.xlu1 %1398 }
 0x1d4   : > { %v1401_v29 = vunpack.i.h.bf16 %v1399_v51  ;;  %v1400_v30 = vunpack.i.l.bf16 %v1399_v51 }
 0x1d7   : > { %v1429_v52 = vpop.permute.xlu1 %1428 }
 0x1d8   : > { %v1431_v49 = vunpack.i.h.bf16 %v1429_v52  ;;  %v1430_v1 = vunpack.i.l.bf16 %v1429_v52 }
 0x1db   : > { %v1434_v55 = vpop.permute.xlu1 %1433  ;;  %v1963_v56 = vpop.permute.xlu0 %1373 }
 0x1dc   : > { %v1436_v8 = vunpack.i.h.bf16 %v1434_v55  ;;  %v1435_v9 = vunpack.i.l.bf16 %v1434_v55  ;;  %v1376_v45 = vunpack.i.h.bf16 %v1963_v56  ;;  %v1375_v46 = vunpack.i.l.bf16 %v1963_v56 }
 0x1df   : > { %v1439_v57 = vpop.permute.xlu1 %1438  ;;  %v1965_v59 = vpop.permute.xlu0 %1378 }
 0x1e0   : > { %v1441_v12 = vunpack.i.h.bf16 %v1439_v57  ;;  %v1440_v14 = vunpack.i.l.bf16 %v1439_v57  ;;  %v1381_v48 = vunpack.i.h.bf16 %v1965_v59  ;;  %v1380_v50 = vunpack.i.l.bf16 %v1965_v59 }
 0x1e1   : > { %v820_v57 = vsel %vm411_vm1, %v491_v47, %v1375_v46 }
 0x1e3   : > { %v1967_v60 = vpop.permute.xlu1 %1448  ;;  %v1969_v58 = vpop.permute.xlu0 %1383 }
 0x1e4   : > { %v1450_v59 = vunpack.i.l.bf16 %v1967_v60 }
 0x1e7   : > { %v1971_v61 = vpop.permute.xlu1 %1473  ;;  %v1973_v63 = vpop.permute.xlu0 %1388 }
 0x1e8   : > { %v1390_v55 = vunpack.i.l.bf16 %v1973_v63 }
 0x1eb   : > { %v1975_v62 = vpop.permute.xlu1 %1478  ;;  %v1394_v0 = vpop.permute.xlu0 %1393 }
 0x1ec   : > { %v1396_v4 = vunpack.i.h.bf16 %v1394_v0  ;;  %v1395_v5 = vunpack.i.l.bf16 %v1394_v0  ;;  %v821_v0 = vsel %vm411_vm1, %v1896_v13, %v1376_v45  ;;  %v1475_v13 = vunpack.i.l.bf16 %v1971_v61 }
 0x1ed   : > { %v2018_v56 = vsel %vm828_vm8, %v821_v0, %v1381_v48 }
 0x1ee   : > { %v823_v21 = vsel %vm411_vm1, %v1931_v32, %v1396_v4  ;;  %v822_v22 = vsel %vm411_vm1, %v1901_v15, %v1395_v5  ;;  %v1386_v5 = vunpack.i.h.bf16 %v1969_v58 }
 0x1ef   : > { %v1977_v2 = vpop.permute.xlu1 %1483  ;;  %v1404_v3 = vpop.permute.xlu0 %1403  ;;  %v831_v32 = vsel %vm828_vm8, %v822_v22, %v1400_v30  ;;  %v832_v15 = vsel %vm828_vm8, %v823_v21, %v1401_v29 }
 0x1f0   : > { %v1406_v6 = vunpack.i.h.bf16 %v1404_v3  ;;  %v1405_v7 = vunpack.i.l.bf16 %v1404_v3 }
 0x1f2   : > { %v867_v10 = vsel %vm281_vm0, %v1406_v6, %v1431_v49  ;;  %v866_v11 = vsel %vm281_vm0, %v1405_v7, %v1430_v1  ;;  %v829_v49 = vsel %vm828_vm8, %v820_v57, %v1380_v50  ;;  %v1451_v1 = vunpack.i.h.bf16 %v1967_v60 }
 0x1f3   : > { %v1981_v16 = vpop.permute.xlu1 %1488  ;;  %v1409_v17 = vpop.permute.xlu0 %1408  ;;  %v875_v18 = vsel %vm872_vm5, %v866_v11, %v1435_v9  ;;  %v876_v19 = vsel %vm872_vm5, %v867_v10, %v1436_v8  ;;  %v1391_v8 = vunpack.i.h.bf16 %v1973_v63  ;;  %v2030_v9 = vsel %vm837_vm9, %v829_v49, %v1390_v55 }
 0x1f4   : > { %v1411_v23 = vunpack.i.h.bf16 %v1409_v17  ;;  %v1410_v24 = vunpack.i.l.bf16 %v1409_v17  ;;  %v884_v25 = vsel %vm881_vm6, %v875_v18, %v1440_v14  ;;  %v885_v28 = vsel %vm881_vm6, %v876_v19, %v1441_v12 }
 0x1f5   : > { %v893_v31 = vpack.c.bf16 %v885_v28, %v884_v25  ;;  %v1481_v10 = vunpack.i.h.bf16 %v1975_v62  ;;  %v1480_v60 = vunpack.i.l.bf16 %v1975_v62  ;;  %v1486_v11 = vunpack.i.h.bf16 %v1977_v2 }
 0x1f6   : > { %v840_v20 = vsel %vm837_vm9, %v831_v32, %v1410_v24  ;;  %v841_v37 = vsel %vm837_vm9, %v832_v15, %v1411_v23  ;;  %v1485_v12 = vunpack.i.l.bf16 %v1977_v2  ;;  %v1491_v18 = vunpack.i.h.bf16 %v1981_v16 }
 0x1f7   : > { %v1991_v33 = vpop.permute.xlu1 %1493  ;;  %v1414_v34 = vpop.permute.xlu0 %1413  ;;  %1254 = vmatprep.mubr.msk.bf16.mxu1 %vm1006_vm7, %v893_v31 }
 0x1f8   : > { %v1416_v35 = vunpack.i.h.bf16 %v1414_v34  ;;  %v1415_v36 = vunpack.i.l.bf16 %v1414_v34  ;;  %v1496_v29 = vunpack.i.h.bf16 %v1991_v33  ;;  %v1495_v2 = vunpack.i.l.bf16 %v1991_v33 }
 0x1fa   : > { %v849_v38 = vsel %vm846_vm10, %v840_v20, %v1415_v36  ;;  %v850_v39 = vsel %vm846_vm10, %v841_v37, %v1416_v35 }
 0x1fb   : > { %v1499_v40 = vpop.permute.xlu1 %1498  ;;  %v2000_v41 = vpop.permute.xlu0 %1418  ;;  %v858_v42 = vsel %vm855_vm11, %v849_v38, %v1405_v7  ;;  %v859_v43 = vsel %vm855_vm11, %v850_v39, %v1406_v6  ;;  %v1385_v6 = vunpack.i.l.bf16 %v1969_v58  ;;  %v1476_v7 = vunpack.i.h.bf16 %v1971_v61  ;;  %v1257_v58 = vld [vmem:[%s2207_s4] ss:$0 sm:$0xff] }
 0x1fc   : > { %v892_v44 = vpack.c.bf16 %v859_v43, %v858_v42  ;;  %v1501_v14 = vunpack.i.h.bf16 %v1499_v40  ;;  %v1490_v61 = vunpack.i.l.bf16 %v1981_v16  ;;  %v1500_v24 = vunpack.i.l.bf16 %v1499_v40 }
 0x1fd   : > { %v1421_v30 = vunpack.i.h.bf16 %v2000_v41  ;;  %v1420_v31 = vunpack.i.l.bf16 %v2000_v41 }
 0x1fe   : > { %1064 = vmatmul.mubr.bf16.vlgmr.msra.gmra.mxu1 %v892_v44  ;;  %v827_v16 = vsel %vm411_vm1, %v1917_v26, %v1501_v14  ;;  %v826_v38 = vsel %vm411_vm1, %v1921_v27, %v1500_v24 }
 0x1ff   : > { %v2008_v51 = vpop.permute.xlu1 %1503  ;;  %v2010_v52 = vpop.permute.xlu0 %1423  ;;  %v864_v63 = vsel %vm281_vm0, %v1385_v6, %v1420_v31 }
 0x200   : > { %v1506_v39 = vunpack.i.h.bf16 %v2008_v51  ;;  %v1505_v40 = vunpack.i.l.bf16 %v2008_v51  ;;  %v1426_v45 = vunpack.i.h.bf16 %v2010_v52 }
 0x202   : > { %v836_v24 = vsel %vm828_vm8, %v827_v16, %v1506_v39 }
 0x203   : > { %v2022_v3 = vpop.permute.xlu1 %1508  ;;  %v1444_v4 = vpop.permute.xlu0 %1443 }
 0x204   : > { %v1510_v17 = vunpack.i.l.bf16 %v2022_v3  ;;  %v1446_v19 = vunpack.i.h.bf16 %v1444_v4  ;;  %v1445_v21 = vunpack.i.l.bf16 %v1444_v4  ;;  %v1511_v25 = vunpack.i.h.bf16 %v2022_v3  ;;  %v1258_v3 = vld [vmem:[%s2208_s5] ss:$0 sm:$0xff] }
 0x206   : > { %v870_v34 = vsel %vm281_vm0, %v1510_v17, %v1475_v13  ;;  %v825_v35 = vsel %vm411_vm1, %v1847_v54, %v1446_v19  ;;  %v824_v33 = vsel %vm411_vm1, %v1845_v53, %v1445_v21  ;;  %v871_v54 = vsel %vm281_vm0, %v1511_v25, %v1476_v7 }
 0x207   : > { %v2039_v22 = vpop.permute.xlu1 %1513  ;;  %v1454_v23 = vpop.permute.xlu0 %1453  ;;  %v833_v46 = vsel %vm828_vm8, %v824_v33, %v1450_v59  ;;  %v834_v27 = vsel %vm828_vm8, %v825_v35, %v1451_v1  ;;  %v879_v47 = vsel %vm872_vm5, %v870_v34, %v1480_v60  ;;  %v880_v55 = vsel %vm872_vm5, %v871_v54, %v1481_v10 }
 0x208   : > { %v1456_v62 = vunpack.i.h.bf16 %v1454_v23  ;;  %v1455_v28 = vunpack.i.l.bf16 %v1454_v23  ;;  %v1516_v48 = vunpack.i.h.bf16 %v2039_v22  ;;  %v1515_v50 = vunpack.i.l.bf16 %v2039_v22 }
 0x209   : > { %v1425_v19 = vunpack.i.l.bf16 %v2010_v52 }
 0x20a   : > { %v869_v32 = vsel %vm281_vm0, %v1456_v62, %v1486_v11  ;;  %v868_v15 = vsel %vm281_vm0, %v1455_v28, %v1485_v12  ;;  %v845_v35 = vsel %vm837_vm9, %v836_v24, %v1516_v48 }
 0x20b   : > { %v878_v36 = vsel %vm872_vm5, %v869_v32, %v1491_v18  ;;  %v877_v20 = vsel %vm872_vm5, %v868_v15, %v1490_v61  ;;  %v1519_v37 = vpop.permute.xlu1 %1518  ;;  %v1459_v26 = vpop.permute.xlu0 %1458  ;;  %v835_v61 = vsel %vm828_vm8, %v826_v38, %v1505_v40  ;;  %v839_v32 = vsel %vm837_vm9, %v2018_v56, %v1391_v8 }
 0x20c   : > { %v1461_v42 = vunpack.i.h.bf16 %v1459_v26  ;;  %v1460_v43 = vunpack.i.l.bf16 %v1459_v26  ;;  %v886_v53 = vsel %vm881_vm6, %v877_v20, %v1495_v2  ;;  %v887_v44 = vsel %vm881_vm6, %v878_v36, %v1496_v29 }
 0x20d   : > { %v895_v0 = vpack.c.bf16 %v887_v44, %v886_v53  ;;  %v1521_v11 = vunpack.i.h.bf16 %v1519_v37  ;;  %v1520_v12 = vunpack.i.l.bf16 %v1519_v37  ;;  %v844_v15 = vsel %vm837_vm9, %v835_v61, %v1515_v50 }
 0x20e   : > { %v842_v59 = vsel %vm837_vm9, %v833_v46, %v1460_v43  ;;  %v843_v1 = vsel %vm837_vm9, %v834_v27, %v1461_v42  ;;  %v865_v56 = vsel %vm281_vm0, %v1386_v5, %v1421_v30  ;;  %v873_v36 = vsel %vm872_vm5, %v864_v63, %v1425_v19 }
 0x20f   : > { %v1529_v51 = vpop.permute.xlu1 %1528  ;;  %v1464_v57 = vpop.permute.xlu0 %1463  ;;  %1255 = vmatprep.mubr.msk.bf16.mxu1 %vm1006_vm7, %v895_v0  ;;  %v853_v33 = vsel %vm846_vm10, %v844_v15, %v1520_v12 }
 0x210   : > { %v1531_v49 = vunpack.i.h.bf16 %v1529_v51  ;;  %v1530_v4 = vunpack.i.l.bf16 %v1529_v51  ;;  %v1466_v7 = vunpack.i.h.bf16 %v1464_v57  ;;  %v1465_v13 = vunpack.i.l.bf16 %v1464_v57 }
 0x211   : > { %v862_v30 = vsel %vm855_vm11, %v853_v33, %v1510_v17 }
 0x212   : > { %v888_v60 = vsel %vm881_vm6, %v879_v47, %v1530_v4  ;;  %v889_v14 = vsel %vm881_vm6, %v880_v55, %v1531_v49  ;;  %v851_v10 = vsel %vm846_vm10, %v842_v59, %v1465_v13  ;;  %v852_v18 = vsel %vm846_vm10, %v843_v1, %v1466_v7 }
 0x213   : > { %v1469_v21 = vpop.permute.xlu0 %1468  ;;  %v860_v22 = vsel %vm855_vm11, %v851_v10, %v1455_v28  ;;  %v861_v23 = vsel %vm855_vm11, %v852_v18, %v1456_v62  ;;  %v897_v52 = vpack.c.bf16 %v889_v14, %v888_v60  ;;  %v854_v28 = vsel %vm846_vm10, %v845_v35, %v1521_v11 }
 0x214   : > { %v1471_v29 = vunpack.i.h.bf16 %v1469_v21  ;;  %v1470_v2 = vunpack.i.l.bf16 %v1469_v21  ;;  %v894_v34 = vpack.c.bf16 %v861_v23, %v860_v22  ;;  %v863_v26 = vsel %vm855_vm11, %v854_v28, %v1511_v25 }
 0x216   : > { %v847_v62 = vsel %vm846_vm10, %v2030_v9, %v1470_v2  ;;  %v848_v16 = vsel %vm846_vm10, %v839_v32, %v1471_v29  ;;  %1072 = vmatmul.mubr.bf16.gmra.mxu1 %v894_v34  ;;  %v874_v9 = vsel %vm872_vm5, %v865_v56, %v1426_v45 }
 0x217   : > { %v1524_v8 = vpop.permute.xlu0 %1523  ;;  %1256 = vmatprep.mubr.msk.bf16.mxu1 %vm1006_vm7, %v897_v52  ;;  %v856_v31 = vsel %vm855_vm11, %v847_v62, %v1385_v6  ;;  %v857_v41 = vsel %vm855_vm11, %v848_v16, %v1386_v5  ;;  %v896_v6 = vpack.c.bf16 %v863_v26, %v862_v30 }
 0x218   : > { %v1526_v20 = vunpack.i.h.bf16 %v1524_v8  ;;  %v1525_v37 = vunpack.i.l.bf16 %v1524_v8  ;;  %v890_v54 = vpack.c.bf16 %v857_v41, %v856_v31 }
 0x21a   : > { %v882_v38 = vsel %vm881_vm6, %v873_v36, %v1525_v37  ;;  %v883_v39 = vsel %vm881_vm6, %v874_v9, %v1526_v20 }
 0x21b   : > { %v891_v40 = vpack.c.bf16 %v883_v39, %v882_v38 }
 0x21d   : > { %1253 = vmatprep.mubr.msk.bf16.mxu0 %vm1006_vm7, %v891_v40 }
 0x21e   : > { %1056 = vmatmul.mubr.bf16.vlgmr.msra.gmra.mxu0 %v890_v54  ;;  %1080 = vmatmul.mubr.bf16.gmra.mxu1 %v896_v6 }
 0x2be   : > { %v1065_v5 = vpop.f32.mrf.mxu1 }
 0x2bf   : > { %v1097_v17 = vmul.f32 %v1257_v58, %v1065_v5 }
 0x2c0   : > { %v1067_v25 = vpop.f32.mrf.mxu1 }
 0x2c1   : > { %v1112_v42 = vadd.f32 %v1258_v3, %v1097_v17 }
 0x2c2   : > { %v1068_v43 = vpop.f32.mrf.mxu1 }
 0x2c3   : > { %v1120_v53 = vmax.f32 %v1112_v42, 0.0  ;;  %v1098_v44 = vmul.f32 %v1257_v58, %v1068_v43 }
 0x2c4   : > { %v1070_v45 = vpop.f32.mrf.mxu1 }
 0x2c5   : > { %1128 = vst.msk [vmem:[%s2133_s28 + $0x10] sm:$0xff] %vm473_vm3, %v1120_v53  ;;  %v1113_v46 = vadd.f32 %v1258_v3, %v1098_v44 }
 0x2c7   : > { %v1121_v27 = vmax.f32 %v1113_v46, 0.0 }
 0x2c9   : > { %1129 = vst.msk [vmem:[%s2133_s28 + $0x18] sm:$0xff] %vm473_vm3, %v1121_v27 }
 0x2d6   : > { %v1073_v47 = vpop.f32.mrf.mxu1 }
 0x2d7   : > { %v1099_v48 = vmul.f32 %v1257_v58, %v1073_v47 }
 0x2d8   : > { %v1075_v50 = vpop.f32.mrf.mxu1 }
 0x2d9   : > { %v1114_v51 = vadd.f32 %v1258_v3, %v1099_v48 }
 0x2da   : > { %v1076_v55 = vpop.f32.mrf.mxu1 }
 0x2db   : > { %v1122_v57 = vmax.f32 %v1114_v51, 0.0  ;;  %v1100_v0 = vmul.f32 %v1257_v58, %v1076_v55 }
 0x2dc   : > { %v1078_v49 = vpop.f32.mrf.mxu1 }
 0x2dd   : > { %1130 = vst.msk [vmem:[%s2133_s28 + $0x20] sm:$0xff] %vm473_vm3, %v1122_v57  ;;  %v1115_v4 = vadd.f32 %v1258_v3, %v1100_v0 }
 0x2de   : > { %v1057_v7 = vpop.f32.mrf.mxu0  ;;  %v1081_v13 = vpop.f32.mrf.mxu1 }
 0x2df   : > { %v1123_v11 = vmax.f32 %v1115_v4, 0.0  ;;  %v1095_v12 = vmul.f32 %v1257_v58, %v1057_v7  ;;  %v1101_v59 = vmul.f32 %v1257_v58, %v1081_v13 }
 0x2e0   : > { %v1059_v1 = vpop.f32.mrf.mxu0  ;;  %v1083_v60 = vpop.f32.mrf.mxu1 }
 0x2e1   : > { %1131 = vst.msk [vmem:[%s2133_s28 + $0x28] sm:$0xff] %vm473_vm3, %v1123_v11  ;;  %v1110_v14 = vadd.f32 %v1258_v3, %v1095_v12  ;;  %v1116_v10 = vadd.f32 %v1258_v3, %v1101_v59 }
 0x2e2   : > { %v1060_v18 = vpop.f32.mrf.mxu0  ;;  %v1084_v61 = vpop.f32.mrf.mxu1 }
 0x2e3   : > { %v1118_v19 = vmax.f32 %v1110_v14, 0.0  ;;  %v1124_v21 = vmax.f32 %v1116_v10, 0.0  ;;  %v1096_v22 = vmul.f32 %v1257_v58, %v1060_v18  ;;  %v1102_v23 = vmul.f32 %v1257_v58, %v1084_v61 }
 0x2e4   : > { %v1062_v24 = vpop.f32.mrf.mxu0  ;;  %v1086_v29 = vpop.f32.mrf.mxu1 }
 0x2e5   : > { %1126 = vst.msk [vmem:[%s2133_s28] sm:$0xff] %vm473_vm3, %v1118_v19  ;;  %1132 = vst.msk [vmem:[%s2133_s28 + $0x30] sm:$0xff] %vm473_vm3, %v1124_v21  ;;  %v1111_v2 = vadd.f32 %v1258_v3, %v1096_v22  ;;  %v1117_v34 = vadd.f32 %v1258_v3, %v1102_v23 }
 0x2e7   : > { %v1119_v32 = vmax.f32 %v1111_v2, 0.0  ;;  %v1125_v15 = vmax.f32 %v1117_v34, 0.0 }
 0x2e9   : > { %1127 = vst.msk [vmem:[%s2133_s28 + $0x8] sm:$0xff] %vm473_vm3, %v1119_v32  ;;  %1133 = vst.msk [vmem:[%s2133_s28 + $0x38] sm:$0xff] %vm473_vm3, %v1125_v15 }
 0x2ea   : > { %1559 = shalt.err (!%p1556_p3)
}
 0x2eb   : > { %s1560_s26 = scalar_lea.hbm %s2152_s15, 1024  ;;  %s1564_s20 = scalar_lea.hbm %s2209_s6, 2048 }
 0x2ec   : > { %p1561_p4 = scmp.ne.s32.totalorder %s2152_s15, %s1560_s26  ;;  %p1565_p9 = scmp.lt.s32.totalorder %s2152_s15, %s2209_s6 }
 0x2ed   : > { %p1566_p10 = scmp.lt.s32.totalorder %s1564_s20, %s1560_s26 }
 0x2ee   : > { %p1562_p7 = pnand %p1561_p4, %p1694_p5 }
 0x2ef   : > { %p1567_p11 = por %p1566_p10, %p1565_p9 }
 0x2f0   : > { %p1563_p8 = pneg %p1562_p7 }
 0x2f2   : > { %p1568_p12 = pnand %p1567_p11, %p1563_p8 }
 0x2f4   : > { %1571 = shalt.err (!%p1568_p12)
}
 0x2f5   : > { %s1620_s10 = smov 128  }
 0x2f6   : > { %1321 = dma.vmem_to_hbm [thread:$0]  (%p1694_p5), %s2154_s9, 1024, %s2152_s15, %s2162_s25, %s1620_s10, %s1620_s10, %s1609_s16  }
 0x2f7 PF: > { %p1327_p13 = scmp.ge.s32.totalorder %s1606_s24, 2  ;;  %s1163_s11 = sand.u32 1, %s1594_s21  }
 0x2f8   : > { %s1164_s18 = scalar_lea.sflag [#allocation4], %s1163_s11 }
 0x2f9   : > { %p1324_p0 = pnand %p1327_p13, %p1698_p6 }
 0x2fb   : > { %p1325_p1 = pneg %p1324_p0 }
 0x2fd   : > { %1589 = dma.done.wait (%p1325_p1), %s1164_s18, 1024  }
 0x2fe   : > { %1591 = vsyncadd (%p1325_p1), %s1164_s18, 4294966272  ;;  %p16_p2 = scmp.ge.s32.totalorder %s1681_s27, 4   ;;  %s2212_s21 = smov %s1598_s22 }
 0x2ff   : > { %s2213_s22 = smov %s1602_s23  ;;  %s2214_s23 = smov %s1692_s30 }
 0x300   : > { %s2215_s24 = smov %s1681_s27  ;;  %18 = sbr.rel (!%p16_p2) target bundleno = 3 (0x3), region = 84 }
 0x305   :  { %1169 = vsyncpa [#allocation4], 1 }
 0x306   :  { %1171 = vsyncpa [#allocation4 + $0x1], 1 }

</bundles_post_ra>
